<compile_context>
chip_gen: v5e
topology: v5e:2x2
jax: 0.10.0
libtpu: 0.0.40
codegen_flags: <defaults>
</compile_context>

<pallas_src>
import math
from functools import partial

import jax
import jax.numpy as jnp
from jax import lax
from jax.experimental import pallas as pl
from jax.experimental.pallas import tpu as pltpu


# ---------------------------------------------------------------------------
# Kernel 1: fused QKV projection.  grid = (B, S // ts)
# ---------------------------------------------------------------------------
def qkv_proj_kernel(x_ref, w_ref, b_ref, q_ref, k_ref, v_ref, *, d_model):
    # x_ref : (1, ts, D) bf16      w_ref : (D, 3D) bf16 (VMEM-resident)
    # b_ref : (1, 3D) f32          q/k/v_ref : (1, ts, D) each
    x = x_ref[0]                                                     # (ts, D)
    acc = jnp.dot(x, w_ref[...], preferred_element_type=jnp.float32)  # (ts, 3D) f32
    acc = acc + b_ref[...]
    q_ref[0] = acc[:, :d_model].astype(q_ref.dtype)
    k_ref[0] = acc[:, d_model:2 * d_model].astype(k_ref.dtype)
    v_ref[0] = acc[:, 2 * d_model:].astype(v_ref.dtype)


# ---------------------------------------------------------------------------
# Kernel 2: flash-style attention with online softmax.
# grid = (B, S // tq, S // tk); heads handled by a small unrolled in-kernel loop.
# The 1/sqrt(head_dim) scale is already folded into q.
# ---------------------------------------------------------------------------
def flash_attn_kernel(q_ref, k_ref, v_ref, o_ref, m_sc, l_sc, acc_sc, *,
                      num_heads, head_dim):
    # q_ref : (1, tq, D)   k_ref / v_ref : (1, tk, D)   o_ref : (1, tq, D)
    # m_sc / l_sc : (H, tq, 1) f32     acc_sc : (H, tq, hd) f32
    ki = pl.program_id(2)

    @pl.when(ki == 0)
    def _():
        m_sc[...] = jnp.full(m_sc.shape, -jnp.inf, dtype=m_sc.dtype)
        l_sc[...] = jnp.zeros(l_sc.shape, dtype=l_sc.dtype)
        acc_sc[...] = jnp.zeros(acc_sc.shape, dtype=acc_sc.dtype)

    for h in range(num_heads):
        cols = slice(h * head_dim, (h + 1) * head_dim)
        q = q_ref[0, :, cols]                                        # (tq, hd) bf16
        k = k_ref[0, :, cols]                                        # (tk, hd) bf16
        v = v_ref[0, :, cols]                                        # (tk, hd) bf16

        # q @ k^T without materializing a transposed K tile.
        s = lax.dot_general(q, k, (((1,), (1,)), ((), ())),
                            preferred_element_type=jnp.float32)      # (tq, tk) f32

        m_prev = m_sc[h]                                             # (tq, 1)
        m_new = jnp.maximum(m_prev, jnp.max(s, axis=-1, keepdims=True))
        alpha = jnp.exp(m_prev - m_new)
        p = jnp.exp(s - m_new)

        l_sc[h] = alpha * l_sc[h] + jnp.sum(p, axis=-1, keepdims=True)
        acc_sc[h] = alpha * acc_sc[h] + jnp.dot(
            p.astype(v.dtype), v, preferred_element_type=jnp.float32)
        m_sc[h] = m_new

    @pl.when(ki == pl.num_programs(2) - 1)
    def _():
        for h in range(num_heads):
            cols = slice(h * head_dim, (h + 1) * head_dim)
            inv_l = pl.reciprocal(l_sc[h], approx=True)              # (tq, 1)
            o_ref[0, :, cols] = (acc_sc[h] * inv_l).astype(o_ref.dtype)


# ---------------------------------------------------------------------------
# Kernel 3: output projection.  grid = (B, S // ts); W_o VMEM-resident.
# ---------------------------------------------------------------------------
def out_proj_kernel(vals_ref, wo_ref, bo_ref, o_ref):
    # vals_ref : (1, ts, D)   wo_ref : (D, D)   bo_ref : (1, D)   o_ref : (1, ts, D)
    acc = jnp.dot(vals_ref[0], wo_ref[...], preferred_element_type=jnp.float32)
    o_ref[0] = (acc + bo_ref[...]).astype(o_ref.dtype)


# ---------------------------------------------------------------------------
# One-time weight preparation (hoisted out of the forward path).
# ---------------------------------------------------------------------------
def prepare_mha_params(w_qkv, b_qkv, w_o, b_o, *, num_heads,
                       compute_dtype=jnp.bfloat16):
    """Rearranges PyTorch-layout weights into the kernel layouts.

    w_qkv : (3D, D) PyTorch nn.Linear weight (out_features, in_features)
    b_qkv : (3D,)
    w_o   : (D, D)
    b_o   : (D,)
    """
    three_d, d_model = w_qkv.shape
    assert three_d == 3 * d_model
    H = num_heads
    hd = d_model // H
    assert H * hd == d_model

    # PyTorch qkv output feature f -> head f // (3hd), within-head offset f % (3hd)
    # with [0,hd)=q, [hd,2hd)=k, [2hd,3hd)=v.
    w_r = w_qkv.reshape(H, 3, hd, d_model)               # (H, 3, hd, D_in)
    b_r = b_qkv.reshape(H, 3, hd)

    # Fold the attention 1/sqrt(hd) scale into the Q projection (weights + bias).
    scale = 1.0 / math.sqrt(hd)
    qkv_scale = jnp.asarray([scale, 1.0, 1.0], dtype=w_qkv.dtype)
    w_r = w_r * qkv_scale.reshape(1, 3, 1, 1)
    b_r = b_r * qkv_scale.reshape(1, 3, 1)

    # Fused weight: columns ordered [q | k | v], head-major within each D-wide block:
    #   column c = g*D + h*hd + j  <-  PyTorch feature row h*3hd + g*hd + j.
    w_fused = jnp.transpose(w_r, (1, 0, 2, 3)).reshape(3 * d_model, d_model)
    w_fused = jnp.transpose(w_fused, (1, 0)).astype(compute_dtype)   # (D, 3D)
    b_fused = jnp.transpose(b_r, (1, 0, 2)).reshape(1, 3 * d_model).astype(jnp.float32)

    w_out = jnp.transpose(w_o, (1, 0)).astype(compute_dtype)         # (D, D)
    b_out = b_o.reshape(1, d_model).astype(jnp.float32)

    return dict(w_fused=w_fused, b_fused=b_fused, w_out=w_out, b_out=b_out)


# ---------------------------------------------------------------------------
# Forward wrapper.
# ---------------------------------------------------------------------------
def _pick_tile(n, cap):
    """Largest tile <= cap that divides n and is a multiple of 8 (else full n)."""
    if n <= cap:
        return n
    for t in range(cap, 7, -8):
        if n % t == 0:
            return t
    return n


def multi_head_attention(x, params, *, num_heads,
                         compute_dtype=jnp.bfloat16,
                         s_tile_cap=256, q_tile_cap=256, kv_tile_cap=256,
                         vmem_limit_bytes=64 * 1024 * 1024):
    """Forward pass matching the PyTorch MultiHeadAttention module.

    x      : (B, S, D) float32
    params : output of prepare_mha_params()
    """
    B, S, D = x.shape
    H = num_heads
    hd = D // H
    assert H * hd == D

    w_fused, b_fused = params["w_fused"], params["b_fused"]
    w_out, b_out = params["w_out"], params["b_out"]

    xc = x.astype(compute_dtype)

    ts = _pick_tile(S, s_tile_cap)
    tq = _pick_tile(S, q_tile_cap)
    tk = _pick_tile(S, kv_tile_cap)

    # --------------------------------------------------------------- 1) fused QKV proj
    q, k, v = pl.pallas_call(
        partial(qkv_proj_kernel, d_model=D),
        out_shape=(jax.ShapeDtypeStruct((B, S, D), compute_dtype),) * 3,
        grid_spec=pltpu.PrefetchScalarGridSpec(
            num_scalar_prefetch=0,
            grid=(B, S // ts),
            in_specs=[
                pl.BlockSpec((1, ts, D), lambda b, s: (b, s, 0)),
                pl.BlockSpec((D, 3 * D), lambda b, s: (0, 0)),   # resident fused weight
                pl.BlockSpec((1, 3 * D), lambda b, s: (0, 0)),
            ],
            out_specs=(
                pl.BlockSpec((1, ts, D), lambda b, s: (b, s, 0)),
                pl.BlockSpec((1, ts, D), lambda b, s: (b, s, 0)),
                pl.BlockSpec((1, ts, D), lambda b, s: (b, s, 0)),
            ),
        ),
        compiler_params=pltpu.CompilerParams(
            dimension_semantics=("parallel", "parallel"),
            vmem_limit_bytes=vmem_limit_bytes),
    )(xc, w_fused, b_fused)

    # --------------------------------------------------------------- 2) flash attention
    o_heads = pl.pallas_call(
        partial(flash_attn_kernel, num_heads=H, head_dim=hd),
        out_shape=jax.ShapeDtypeStruct((B, S, D), compute_dtype),
        grid_spec=pltpu.PrefetchScalarGridSpec(
            num_scalar_prefetch=0,
            grid=(B, S // tq, S // tk),
            in_specs=[
                pl.BlockSpec((1, tq, D), lambda b, qi, ki: (b, qi, 0)),
                pl.BlockSpec((1, tk, D), lambda b, qi, ki: (b, ki, 0)),
                pl.BlockSpec((1, tk, D), lambda b, qi, ki: (b, ki, 0)),
            ],
            out_specs=pl.BlockSpec((1, tq, D), lambda b, qi, ki: (b, qi, 0)),
            scratch_shapes=[
                pltpu.VMEM((H, tq, 1), jnp.float32),    # running max per head
                pltpu.VMEM((H, tq, 1), jnp.float32),    # running sum per head
                pltpu.VMEM((H, tq, hd), jnp.float32),   # accumulator per head
            ],
        ),
        compiler_params=pltpu.CompilerParams(
            dimension_semantics=("parallel", "parallel", "arbitrary"),
            vmem_limit_bytes=vmem_limit_bytes),
    )(q, k, v)

    # --------------------------------------------------------------- 3) output proj
    out = pl.pallas_call(
        out_proj_kernel,
        out_shape=jax.ShapeDtypeStruct((B, S, D), x.dtype),
        grid_spec=pltpu.PrefetchScalarGridSpec(
            num_scalar_prefetch=0,
            grid=(B, S // ts),
            in_specs=[
                pl.BlockSpec((1, ts, D), lambda b, s: (b, s, 0)),
                pl.BlockSpec((D, D), lambda b, s: (0, 0)),       # resident W_o
                pl.BlockSpec((1, D), lambda b, s: (0, 0)),
            ],
            out_specs=pl.BlockSpec((1, ts, D), lambda b, s: (b, s, 0)),
        ),
        compiler_params=pltpu.CompilerParams(
            dimension_semantics=("parallel", "parallel"),
            vmem_limit_bytes=vmem_limit_bytes),
    )(o_heads, w_out, b_out)

    return out


# ---------------------------------------------------------------------------
# Pure-JAX reference replicating the PyTorch module (f32).
# ---------------------------------------------------------------------------
def reference_mha(x, w_qkv, b_qkv, w_o, b_o, *, num_heads):
    B, S, D = x.shape
    hd = D // num_heads
    qkv = x @ w_qkv.T + b_qkv                                         # (B, S, 3D)
    qkv = qkv.reshape(B, S, num_heads, 3 * hd).transpose(0, 2, 1, 3)   # (B, H, S, 3hd)
    q, k, v = jnp.split(qkv, 3, axis=-1)
    s = jnp.einsum("bhqd,bhkd->bhqk", q, k) / math.sqrt(hd)
    attn = jax.nn.softmax(s, axis=-1)
    vals = jnp.einsum("bhqk,bhkd->bhqd", attn, v)
    vals = vals.transpose(0, 2, 1, 3).reshape(B, S, D)
    return vals @ w_o.T + b_o


if __name__ == "__main__":
    def run_case(B, S, d_model, num_heads):
        key = jax.random.PRNGKey(0)
        kx, k1, k2, k3, k4 = jax.random.split(key, 5)

        x = jax.random.normal(kx, (B, S, d_model), dtype=jnp.float32)

        # nn.Linear-style init: U(-1/sqrt(fan_in), 1/sqrt(fan_in)), PyTorch (out, in).
        bound = 1.0 / math.sqrt(d_model)
        w_qkv = jax.random.uniform(k1, (3 * d_model, d_model), jnp.float32, -bound, bound)
        b_qkv = jax.random.uniform(k2, (3 * d_model,), jnp.float32, -bound, bound)
        w_o = jax.random.uniform(k3, (d_model, d_model), jnp.float32, -bound, bound)
        b_o = jax.random.uniform(k4, (d_model,), jnp.float32, -bound, bound)

        # Weight rearrangement done once, outside the forward path.
        params = prepare_mha_params(w_qkv, b_qkv, w_o, b_o, num_heads=num_heads)

        out = multi_head_attention(x, params, num_heads=num_heads)
        out = jax.block_until_ready(out)

        ref = reference_mha(x, w_qkv, b_qkv, w_o, b_o, num_heads=num_heads)
        assert out.shape == (B, S, d_model)
        # bf16 MXU operands -> compare against the f32 reference with bf16 tolerance.
        err = float(jnp.max(jnp.abs(out - ref)))
        assert jnp.allclose(out, ref, atol=5e-2, rtol=5e-2), (
            f"mismatch vs reference (B={B}, S={S}, D={d_model}, H={num_heads}), "
            f"max abs diff = {err}")

    # Small, module-consistent shapes (single tile, small head_dim).
    run_case(B=2, S=8, d_model=32, num_heads=4)
    # Multi-tile case exercising the online-softmax accumulation and lane-aligned heads.
    run_case(B=2, S=512, d_model=256, num_heads=2)

    print("KERNEL_OK")
</pallas_src>

<mosaic_0001>
module attributes {stable_mosaic.version = 11 : i64} {
  func.func @qkv_proj_kernel(%arg0: i32, %arg1: i32, %arg2: memref<1x8x32xbf16, #tpu.memory_space<vmem>>, %arg3: memref<32x96xbf16, #tpu.memory_space<vmem>>, %arg4: memref<1x96xf32, #tpu.memory_space<vmem>>, %arg5: memref<1x8x32xbf16, #tpu.memory_space<vmem>>, %arg6: memref<1x8x32xbf16, #tpu.memory_space<vmem>>, %arg7: memref<1x8x32xbf16, #tpu.memory_space<vmem>>) attributes {dimension_semantics = [#tpu.dimension_semantics<parallel>, #tpu.dimension_semantics<parallel>], iteration_bounds = array<i64: 2, 1>, scalar_prefetch = 0 : i64, scratch_operands = 0 : i64, tpu.core_type = #tpu.core_type<tc>, window_params = [{transform_indices = @transform_0, window_bounds = array<i64: 1, 8, 32>}, {pipeline_mode = #tpu.pipeline_mode<synchronous>, transform_indices = @transform_1, window_bounds = array<i64: 32, 96>}, {pipeline_mode = #tpu.pipeline_mode<synchronous>, transform_indices = @transform_2, window_bounds = array<i64: 1, 96>}, {transform_indices = @transform_3, window_bounds = array<i64: 1, 8, 32>}, {transform_indices = @transform_4, window_bounds = array<i64: 1, 8, 32>}, {transform_indices = @transform_5, window_bounds = array<i64: 1, 8, 32>}]} {
    %c0 = arith.constant 0 : index
    %c0_0 = arith.constant 0 : index
    %c0_1 = arith.constant 0 : index
    %0 = vector.load %arg2[%c0, %c0_0, %c0_1] : memref<1x8x32xbf16, #tpu.memory_space<vmem>>, vector<1x8x32xbf16>
    %1 = vector.shape_cast %0 : vector<1x8x32xbf16> to vector<8x32xbf16>
    %c0_2 = arith.constant 0 : index
    %c0_3 = arith.constant 0 : index
    %2 = vector.load %arg3[%c0_2, %c0_3] : memref<32x96xbf16, #tpu.memory_space<vmem>>, vector<32x96xbf16>
    %cst = arith.constant dense<0.000000e+00> : vector<8x96xf32>
    %3 = tpu.matmul %1, %2, %cst {dimension_numbers = #tpu.dot_dimension_numbers<[1], [0], [0], [1], [0, 0, 1, 1], [], []>} : vector<8x32xbf16>, vector<32x96xbf16>, vector<8x96xf32> -> vector<8x96xf32>
    %c0_4 = arith.constant 0 : index
    %c0_5 = arith.constant 0 : index
    %4 = vector.load %arg4[%c0_4, %c0_5] : memref<1x96xf32, #tpu.memory_space<vmem>>, vector<1x96xf32>
    %5 = vector.broadcast %4 : vector<1x96xf32> to vector<8x96xf32>
    %6 = arith.addf %3, %5 : vector<8x96xf32>
    %7 = vector.extract_strided_slice %6 {offsets = [0, 0], sizes = [8, 32], strides = [1, 1]} : vector<8x96xf32> to vector<8x32xf32>
    %8 = arith.truncf %7 : vector<8x32xf32> to vector<8x32xbf16>
    %c0_6 = arith.constant 0 : index
    %c0_7 = arith.constant 0 : index
    %c0_8 = arith.constant 0 : index
    %9 = vector.load %arg5[%c0_6, %c0_7, %c0_8] : memref<1x8x32xbf16, #tpu.memory_space<vmem>>, vector<1x8x32xbf16>
    %10 = vector.shape_cast %9 : vector<1x8x32xbf16> to vector<8x32xbf16>
    %11 = vector.shape_cast %8 : vector<8x32xbf16> to vector<1x8x32xbf16>
    tpu.vector_store %arg5[%c0_6, %c0_7, %c0_8], %11 {strides = array<i32>} : memref<1x8x32xbf16, #tpu.memory_space<vmem>>, vector<1x8x32xbf16>,
    %12 = vector.extract_strided_slice %6 {offsets = [0, 32], sizes = [8, 32], strides = [1, 1]} : vector<8x96xf32> to vector<8x32xf32>
    %13 = arith.truncf %12 : vector<8x32xf32> to vector<8x32xbf16>
    %c0_9 = arith.constant 0 : index
    %c0_10 = arith.constant 0 : index
    %c0_11 = arith.constant 0 : index
    %14 = vector.load %arg6[%c0_9, %c0_10, %c0_11] : memref<1x8x32xbf16, #tpu.memory_space<vmem>>, vector<1x8x32xbf16>
    %15 = vector.shape_cast %14 : vector<1x8x32xbf16> to vector<8x32xbf16>
    %16 = vector.shape_cast %13 : vector<8x32xbf16> to vector<1x8x32xbf16>
    tpu.vector_store %arg6[%c0_9, %c0_10, %c0_11], %16 {strides = array<i32>} : memref<1x8x32xbf16, #tpu.memory_space<vmem>>, vector<1x8x32xbf16>,
    %17 = vector.extract_strided_slice %6 {offsets = [0, 64], sizes = [8, 32], strides = [1, 1]} : vector<8x96xf32> to vector<8x32xf32>
    %18 = arith.truncf %17 : vector<8x32xf32> to vector<8x32xbf16>
    %c0_12 = arith.constant 0 : index
    %c0_13 = arith.constant 0 : index
    %c0_14 = arith.constant 0 : index
    %19 = vector.load %arg7[%c0_12, %c0_13, %c0_14] : memref<1x8x32xbf16, #tpu.memory_space<vmem>>, vector<1x8x32xbf16>
    %20 = vector.shape_cast %19 : vector<1x8x32xbf16> to vector<8x32xbf16>
    %21 = vector.shape_cast %18 : vector<8x32xbf16> to vector<1x8x32xbf16>
    tpu.vector_store %arg7[%c0_12, %c0_13, %c0_14], %21 {strides = array<i32>} : memref<1x8x32xbf16, #tpu.memory_space<vmem>>, vector<1x8x32xbf16>,
    return
  }
  func.func @transform_0(%arg0: i32, %arg1: i32) -> (i32, i32, i32) {
    %c0_i32 = arith.constant 0 : i32
    %c0_i32_0 = arith.constant 0 : i32
    return %arg0, %arg1, %c0_i32 : i32, i32, i32
  }
  func.func @transform_1(%arg0: i32, %arg1: i32) -> (i32, i32) {
    %c0_i32 = arith.constant 0 : i32
    %c0_i32_0 = arith.constant 0 : i32
    %c0_i32_1 = arith.constant 0 : i32
    return %c0_i32, %c0_i32_0 : i32, i32
  }
  func.func @transform_2(%arg0: i32, %arg1: i32) -> (i32, i32) {
    %c0_i32 = arith.constant 0 : i32
    %c0_i32_0 = arith.constant 0 : i32
    %c0_i32_1 = arith.constant 0 : i32
    return %c0_i32, %c0_i32_0 : i32, i32
  }
  func.func @transform_3(%arg0: i32, %arg1: i32) -> (i32, i32, i32) {
    %c0_i32 = arith.constant 0 : i32
    %c0_i32_0 = arith.constant 0 : i32
    return %arg0, %arg1, %c0_i32 : i32, i32, i32
  }
  func.func @transform_4(%arg0: i32, %arg1: i32) -> (i32, i32, i32) {
    %c0_i32 = arith.constant 0 : i32
    %c0_i32_0 = arith.constant 0 : i32
    return %arg0, %arg1, %c0_i32 : i32, i32, i32
  }
  func.func @transform_5(%arg0: i32, %arg1: i32) -> (i32, i32, i32) {
    %c0_i32 = arith.constant 0 : i32
    %c0_i32_0 = arith.constant 0 : i32
    return %arg0, %arg1, %c0_i32 : i32, i32, i32
  }
}

</mosaic_0001>

<bundles_post_ra>
// kernel: tpu_custom_call.1
= control target key start
LH: loop header
LB: loop body
LE: loop exit
PB: predicated region body
PF: predicated region fallthrough
CT: control target
= control target key end

     0   :  { %s1119_s0 = inlined_call_operand.hbm [shape: bf16[2,8,32], index: 0, kind: input, shape index: {}]   ;;  %s1120_s1 = inlined_call_operand.hbm [shape: bf16[32,96], index: 1, kind: input, shape index: {}]   ;;  %s1121_s2 = inlined_call_operand.vmem [shape: f32[1,96], index: 2, kind: input, shape index: {}]   ;;  %s1122_s3 = inlined_call_operand.hbm [shape: bf16[2,8,32], index: 3, kind: output, shape index: {0}]   ;;  %s1123_s4 = inlined_call_operand.hbm [shape: bf16[2,8,32], index: 4, kind: output, shape index: {1}]   ;;  %s1124_s5 = inlined_call_operand.hbm [shape: bf16[2,8,32], index: 5, kind: output, shape index: {2}]  }
   0x1   :  { %1126 = sst [smem:[#allocation15_spill]] %s1119_s0 }
   0x2   :  { %11 = vsyncpa [#allocation3], 0 }
   0x3   :  { %13 = vsyncpa [#allocation3 + $0x1], 0 }
   0x4   :  { %14 = vsyncpa [#allocation6], 0 }
   0x5   :  { %15 = vsyncpa [#allocation4], 0 }
   0x6   :  { %17 = vsyncpa [#allocation4 + $0x1], 0 }
   0x7   :  { %18 = vsyncpa [#allocation9], 0 }
   0x8   :  { %20 = vsyncpa [#allocation9 + $0x1], 0  ;;  %s924_s18 = smov 0   ;;  %s926_s19 = smov 0  }
   0x9   :  { %s928_s20 = smov 0   ;;  %s930_s21 = smov 0  }
   0xa   :  { %s932_s22 = smov 0   ;;  %s934_s23 = smov 0  }
   0xb LB: > { %s955_s24 = sadd.s32 4294967295, %s887_s23   ;;  %p563_p0 = scmp.ge.s32.totalorder %s887_s23, 1  ;;  %s887_s23 = sphi %s934_s23, %s26_s23   ;;  %s883_s22 = sphi %s932_s22, %s1138_s22   ;;  %s879_s21 = sphi %s930_s21, %s1137_s21   ;;  %s875_s20 = sphi %s928_s20, %s1136_s20   ;;  %s871_s19 = sphi %s926_s19, %s1135_s19   ;;  %s867_s18 = sphi %s924_s18, %s1134_s18  }
   0xc   : > { %p61_p1 = scmp.eq.s32.totalorder %s955_s24, 0  ;;  %p197_p2 = scmp.lt.s32.totalorder %s887_s23, 3 }
   0xd   : > { %s208_s27 = sshll.u32 %s1120_s1, 4  ;;  %s889_s29 = smov [#allocation5]   ;;  %s209_s27 = int_to_ptr.hbm [resolvable:$true] %s208_s27 }
   0xe   : > { %p963_p3 = pnand %p563_p0, %p197_p2  ;;  %s210_s30 = sshll.u32 %s889_s29, 4  ;;  %s211_s30 = int_to_ptr.vmem [resolvable:$true] %s210_s30 }
   0xf   : > { %p565_p6 = scmp.ge.s32.totalorder %s887_s23, 2  ;;  %s890_s6 = smov 64  }
  0x10   : > { %p605_p4 = pneg %p963_p3  ;;  %s891_s7 = smov 4  }
  0x11   : > { %s1125_s8 = sadd.s32 4294967294, %s887_s23   ;;  %s38_s9 = sadd.s32 1, %s883_s22 }
  0x12   : > { %p606_p5 = pnand %p605_p4, %p61_p1  ;;  %s47_s10 = sadd.s32 1, %s875_s20 }
  0x13   : > { %p40_p7 = scmp.ge.s32.totalorder %s38_s9, 2  ;;  %p54_p8 = scmp.ne.s32.totalorder %s875_s20, %s871_s19 }
  0x14   : > { %608 = dma.hbm_to_vmem [thread:$0]  (!%p606_p5), %s209_s27, 256, %s211_s30, [#allocation6], %s890_s6, %s890_s6, %s891_s7  }
  0x15   : > { %p55_p9 = scmp.eq.s32.totalorder %s887_s23, 0  ;;  %p60_p10 = scmp.ne.s32.totalorder %s871_s19, %s867_s18 }
  0x16   : > { %s1140_s9 = smov (%p40_p7, %s38_s9), 0  ;;  %p128_p13 = scmp.eq.s32.totalorder %s955_s24, 1 }
  0x17   : > { %p982_p11 = por %p55_p9, %p54_p8  ;;  %p988_p12 = por %p61_p1, %p60_p10 }
  0x18   : > { %s42_s13 = ssub.s32 %s883_s22, %s1140_s9  ;;  %p134_p2 = scmp.eq.s32.totalorder %s1125_s8, 1 }
  0x19   : > { %p45_p0 = scmp.eq.s32.totalorder %s42_s13, 0  ;;  %p997_p4 = por %p128_p13, %p54_p8 }
  0x1a   : > { %p624_p5 = scmp.lt.s32.totalorder %s887_s23, 2  ;;  %p1005_p7 = por %p134_p2, %p60_p10 }
  0x1b   : > { %s1003_s15 = scalar_select %p45_p0, %s875_s20, %s47_s10  }
  0x1c   : > { %s227_s17 = sand.u32 1, %s875_s20   ;;  %s567_s26 = sshll.u32 %s883_s22, 2 }
  0x1d   : > { %s566_s25 = sshll.u32 %s227_s17, 2  ;;  %s1132_s0 = sld [smem:[#allocation15_spill]] }
  0x1e   : > { %s231_s6 = scalar_lea.vmem [#allocation2], %s566_s25  ;;  %p610_p8 = pnand %p624_p5, %p982_p11 }
  0x1f   : > { %s240_s7 = sshll.u32 %s231_s6, 4  ;;  %s228_s10 = scalar_lea.sflag [#allocation3], %s227_s17  ;;  %s241_s7 = int_to_ptr.vmem [resolvable:$true] %s240_s7 }
  0x20   : > { %s1019_s8 = sand.u32 (!%p963_p3), 1, %s871_s19  }
  0x21   : > { %249 = sbr.rel (%p963_p3) target bundleno = 310 (0x136), region = 32  ;;  %s1022_s27 = sshll.u32 (!%p963_p3), %s1019_s8, 2 }
  0x22   : > { %s252_s25 = scalar_lea.sflag (!%p963_p3), [#allocation3], %s1019_s8 }
  0x23   : > { %s236_s30 = scalar_lea.hbm %s1132_s0, %s567_s26  ;;  %s255_s26 = scalar_lea.vmem (!%p963_p3), [#allocation2], %s1022_s27 }
  0x24   : > { %s238_s13 = sshll.u32 %s236_s30, 4  ;;  %s239_s13 = int_to_ptr.hbm [resolvable:$true] %s238_s13 }
  0x25   : > { %612 = dma.hbm_to_vmem [thread:$0]  (!%p610_p8), %s239_s13, 64, %s241_s7, %s228_s10  }
  0x26   : > { %850 = dma.done.wait (%p988_p12), %s252_s25, 64  }
  0x27   : > { %852 = vsyncadd (%p988_p12), %s252_s25, 4294967232 }
  0x28   : > { %854 = dma.done.wait (%p61_p1), [#allocation6], 256  }
  0x29   : > { %856 = vsyncadd (%p61_p1), [#allocation6], 4294967040  ;;  %v592_v0 = vld [vmem:[#allocation5 + $0x8] sm:$0xff]  ;;  %v591_v1 = vld [vmem:[#allocation5] sm:$0xff]  ;;  %vm320_vm0 = vcmask 261120   ;;  %s1038_s12 = sshll.u32 %s879_s21, 2 }
  0x2a   : > { %330 = vmatpush.bf16.msra.mxu0 %v592_v0  ;;  %v299_v2 = vld [vmem:[%s255_s26] sm:$0xf]  ;;  %s371_s30 = scalar_lea.hbm %s1122_s3, %s1038_s12  ;;  %vm338_vm1 = vcmask 257024   ;;  %s283_s6 = scalar_lea.vmem [#allocation7], %s1022_s27 }
  0x2b   : > { %v680_v3 = vld [vmem:[%s1121_s2] ss:$0 sm:$0xff]  ;;  %s373_s7 = sshll.u32 %s283_s6, 4  ;;  %s375_s13 = sshll.u32 %s371_s30, 4  ;;  %s374_s7 = int_to_ptr.vmem [resolvable:$true] %s373_s7  ;;  %s376_s13 = int_to_ptr.hbm [resolvable:$true] %s375_s13 }
  0x2c   : > { %s892_s10 = smov 96   ;;  %s350_s21 = scalar_lea.sflag [#allocation4], %s1019_s8 }
  0x2d   : > { %s755_s25 = sshra.s32 %s376_s13, 4  ;;  %s761_s17 = scalar_lea.hbm %s1122_s3, 8  ;;  %s756_s25 = int_to_ptr.hbm [resolvable:$true] %s755_s25 }
  0x2e   : > { %331 = vmatpush.bf16.msra.mxu0 %v591_v1  ;;  %s757_s26 = scalar_lea.hbm %s756_s25, 4  ;;  %p762_p10 = scmp.lt.s32.totalorder %s756_s25, %s1122_s3 }
  0x2f   : > { %p758_p1 = scmp.ne.s32.totalorder %s756_s25, %s757_s26  ;;  %p763_p11 = scmp.lt.s32.totalorder %s761_s17, %s757_s26 }
  0x31   : > { %582 = vmatmul.msk.bf16.vlgmr.msra.gmra.mxu0 %vm320_vm0, %v299_v2  ;;  %p759_p3 = pnand %p758_p1, %p997_p4  ;;  %p764_p12 = por %p763_p11, %p762_p10 }
  0x33   : > { %p760_p9 = pneg %p759_p3 }
  0x35   : > { %p765_p13 = pnand %p764_p12, %p760_p9 }
  0xae   : > { %v333_v4 = vpop.f32.mrf.mxu0 }
  0xaf   : > { %v334_v5 = vadd.f32 %v680_v3, %v333_v4 }
  0xb1   : > { %v337_v6 = vpack.c.bf16 %v334_v5, %v334_v5 }
  0xb3   : > { %341 = vrot.lane.b32.xlu0 %v337_v6, %s892_s10  ;;  %339 = vst.msk [vmem:[%s283_s6] sm:$0xf] %vm338_vm1, %v337_v6 }
  0xb4   : > { %768 = shalt.err (!%p765_p13)
}
  0xb5   : > { %599 = dma.vmem_to_hbm [thread:$0]  (%p997_p4), %s374_s7, 64, %s376_s13, %s350_s21  }
  0xb6   : > { %v335_v7 = vpop.f32.mrf.mxu0  ;;  %s893_s8 = smov 64   ;;  %s386_s28 = scalar_lea.hbm %s1123_s4, %s1038_s12 }
  0xb7   : > { %s354_s25 = sand.u32 1, %s955_s24   ;;  %s290_s26 = scalar_lea.vmem [#allocation8], %s1022_s27 }
  0xb8   : > { %s388_s11 = sshll.u32 %s290_s26, 4  ;;  %s390_s17 = sshll.u32 %s386_s28, 4  ;;  %s389_s11 = int_to_ptr.vmem [resolvable:$true] %s388_s11  ;;  %s391_s17 = int_to_ptr.hbm [resolvable:$true] %s390_s17 }
  0xb9   : > { %s401_s7 = scalar_lea.hbm %s1124_s5, %s1038_s12  ;;  %s1068_s13 = scalar_lea.sflag [#allocation9], %s354_s25 }
  0xba   : > { %s783_s21 = sshra.s32 %s391_s17, 4  ;;  %s789_s10 = scalar_lea.hbm %s1123_s4, 8  ;;  %s784_s21 = int_to_ptr.hbm [resolvable:$true] %s783_s21 }
  0xbb   : > { %345 = vrot.lane.b32.xlu0 %v337_v6, %s893_s8  ;;  %s785_s8 = scalar_lea.hbm %s784_s21, 4  ;;  %p790_p8 = scmp.lt.s32.totalorder %s784_s21, %s1123_s4 }
  0xbc   : > { %p786_p0 = scmp.ne.s32.totalorder %s784_s21, %s785_s8  ;;  %p791_p1 = scmp.lt.s32.totalorder %s789_s10, %s785_s8 }
  0xbe   : > { %p787_p2 = pnand %p786_p0, %p997_p4  ;;  %p792_p3 = por %p791_p1, %p790_p8 }
  0xc0   : > { %p788_p5 = pneg %p787_p2 }
  0xc2   : > { %p793_p9 = pnand %p792_p3, %p788_p5 }
 0x125   : > { %v342_v8 = vpop.permute.xlu0 %341 }
 0x126   : > { %344 = vst.msk [vmem:[%s290_s26] sm:$0xf] %vm338_vm1, %v342_v8 }
 0x127   : > { %796 = shalt.err (!%p793_p9)
}
 0x128   : > { %600 = dma.vmem_to_hbm [thread:$0]  (%p997_p4), %s389_s11, 64, %s391_s17, %s1068_s13  }
 0x129   : > { %s297_s12 = scalar_lea.vmem [#allocation10], %s1022_s27  ;;  %s405_s26 = sshll.u32 %s401_s7, 4  ;;  %s406_s26 = int_to_ptr.hbm [resolvable:$true] %s405_s26 }
 0x12a   : > { %s403_s25 = sshll.u32 %s297_s12, 4  ;;  %s811_s0 = sshra.s32 %s406_s26, 4  ;;  %s404_s25 = int_to_ptr.vmem [resolvable:$true] %s403_s25  ;;  %s812_s0 = int_to_ptr.hbm [resolvable:$true] %s811_s0 }
 0x12b   : > { %s813_s29 = scalar_lea.hbm %s812_s0, 4  ;;  %s817_s8 = scalar_lea.hbm %s1124_s5, 8 }
 0x12c   : > { %p814_p10 = scmp.ne.s32.totalorder %s812_s0, %s813_s29  ;;  %p818_p13 = scmp.lt.s32.totalorder %s812_s0, %s1124_s5 }
 0x12d   : > { %v346_v9 = vpop.permute.xlu0 %345  ;;  %p819_p0 = scmp.lt.s32.totalorder %s817_s8, %s813_s29 }
 0x12e   : > { %348 = vst.msk [vmem:[%s297_s12] sm:$0xf] %vm338_vm1, %v346_v9  ;;  %p815_p11 = pnand %p814_p10, %p997_p4 }
 0x12f   : > { %p820_p2 = por %p819_p0, %p818_p13 }
 0x130   : > { %p816_p12 = pneg %p815_p11 }
 0x132   : > { %p821_p5 = pnand %p820_p2, %p816_p12 }
 0x134   : > { %824 = shalt.err (!%p821_p5)
}
 0x135   : > { %601 = dma.vmem_to_hbm [thread:$0]  (%p997_p4), %s404_s25, 64, %s406_s26, %s1068_s13  }
 0x136 PF: > { %s417_s17 = sand.u32 1, %s867_s18   ;;  %p614_p8 = pnand %p565_p6, %p1005_p7 }
 0x137   : > { %s418_s7 = scalar_lea.sflag [#allocation4], %s417_s17 }
 0x138   : > { %p615_p1 = pneg %p614_p8 }
 0x13a   : > { %858 = dma.done.wait (%p615_p1), %s418_s7, 64  }
 0x13b   : > { %860 = vsyncadd (%p615_p1), %s418_s7, 4294967232  ;;  %s1133_s24 = sadd.s32 4294967294, %s887_s23  }
 0x13c   : > { %s427_s6 = sand.u32 1, %s1133_s24  }
 0x13d   : > { %s428_s10 = scalar_lea.sflag [#allocation9], %s427_s6 }
 0x13e   : > { %862 = dma.done.wait (%p615_p1), %s428_s10, 128  }
 0x13f   : > { %864 = vsyncadd (%p615_p1), %s428_s10, 4294967168  ;;  %s26_s23 = sadd.s32 1, %s887_s23   ;;  %s1134_s18 = smov %s871_s19 }
 0x140   : > { %p23_p4 = scmp.ge.s32.totalorder %s26_s23, 4   ;;  %s1135_s19 = smov %s875_s20 }
 0x141   : > { %s1136_s20 = smov %s1003_s15  ;;  %s1137_s21 = smov %s883_s22 }
 0x142   : > { %s1138_s22 = smov %s1140_s9  ;;  %25 = sbr.rel (!%p23_p4) target bundleno = 11 (0xb), region = 113 }
 0x147   :  { %444 = vsyncpa [#allocation3], 1 }
 0x148   :  { %446 = vsyncpa [#allocation3 + $0x1], 1 }
 0x149   :  { %447 = vsyncpa [#allocation6], 1 }
 0x14a   :  { %448 = vsyncpa [#allocation4], 1 }
 0x14b   :  { %450 = vsyncpa [#allocation4 + $0x1], 1 }
 0x14c   :  { %451 = vsyncpa [#allocation9], 1 }
 0x14d   :  { %453 = vsyncpa [#allocation9 + $0x1], 1 }

</bundles_post_ra>
